<compile_context>
chip_gen: v5e
topology: v5e:2x2
jax: 0.10.0
libtpu: 0.0.40
codegen_flags: <defaults>
</compile_context>

<pallas_src>
import jax
import jax.numpy as jnp
from jax import lax
from jax.experimental import pallas as pl
from jax.experimental.pallas import tpu as pltpu

# ----------------------------- hyper-parameters ------------------------------
B = 2                      # batch
MKT_NUM = 10
MKT_EMB_DIM = 4
CROP_NUM = 6
CROP_EMB_DIM = 4
INPUT_LEN = 8              # L (price sequence length)
NUM_CHANNELS = (8, 16)     # TCN channels per TemporalBlock
OUTPUT_LEN = 4
KS = 3                     # kernel_size
C1, C2 = NUM_CHANNELS
EMB_CAT = MKT_EMB_DIM + CROP_EMB_DIM                # 8
IN_FEAT = INPUT_LEN + EMB_CAT                       # fc in_features == 16
K = C2                                              # seq-len of mkt_x / crop_x
LANES = 128                                         # full vreg lane width
BLK = 16                                            # lane stride per example
assert K == IN_FEAT, "reference forward requires num_channels[-1] == fc in_features"
assert BLK == INPUT_LEN + EMB_CAT                   # per-example column block
assert BLK & (BLK - 1) == 0                         # masks use lane & (BLK-1)
assert B * BLK <= LANES

# ----------------------- packed-weight slab layout ---------------------------
# (row_start, row_len, col_start, col_len) inside a single (64, 64) f32 array.
# All row offsets are multiples of 8 (sublane aligned).
PACK_R, PACK_C = 64, 64
PK_W1  = (0,  C1, 0, KS)            # conv1 weight (C1, KS), Cin = 1
PK_B1  = (0,  C1, 3, 1)
PK_WD1 = (0,  C1, 4, 1)             # 1x1 downsample1 weight (C1, 1)
PK_BD1 = (0,  C1, 5, 1)
PK_B2  = (0,  C1, 6, 1)
PK_W2  = (8,  C1, 0, KS * C1)       # conv2 packed (C1, KS*C1)
PK_W3D = (16, 2 * C2, 0, KS * C1)   # [conv3 (C2,KS*C1) ; downsample2 in tap-2 cols]
PK_B3  = (16, C2, 24, 1)
PK_BD2 = (16, C2, 25, 1)
PK_B4  = (32, C2, 24, 1)
PK_W4  = (48, C2, 0, KS * C2)       # conv4 packed (C2, KS*C2)
PK_WFC = (48, OUTPUT_LEN, 48, K)    # fc weight (OUTPUT_LEN, K)
PK_BFC = (56, OUTPUT_LEN, 48, 1)    # fc bias as a column (OUTPUT_LEN, 1)


# --------------------------------- kernel ------------------------------------
def p1_kernel(price_ref, emb_ref, pack_ref, out_ref):
    f32 = jnp.float32

    def mm(a, b):
        return jnp.dot(a, b, preferred_element_type=f32)

    def pk(spec):
        r, nr, c, nc = spec
        return pack_ref[r:r + nr, c:c + nc]

    # Per-lane causal masks: lane j belongs to example j // BLK at time j % BLK.
    lane = lax.broadcasted_iota(jnp.int32, (1, LANES), 1)
    tpos = lane & (BLK - 1)
    m1 = (tpos >= 1).astype(f32)
    m2 = (tpos >= 2).astype(f32)
    m4 = (tpos >= 4).astype(f32)
    tcn_lane = ((tpos < INPUT_LEN) & (lane < B * BLK)).astype(f32)

    def shift(x, s, m):
        # causal time shift: out[:, j] = x[:, j - s], zero where (j % BLK) < s.
        # (XLU lane rotate + VPU mask -> no MXU involvement.)
        return pltpu.roll(x, shift=s, axis=1) * m

    # Pre-shifted conv1 inputs (shift-2 / shift-1 / unshifted), lane-aligned.
    x2 = price_ref[:, 0:LANES]
    x1 = price_ref[:, LANES:2 * LANES]
    x0 = price_ref[:, 2 * LANES:3 * LANES]

    # ----------------------- temporal block 1 (dilation 1) -------------------
    # conv1 (Cin = 1): pure VPU broadcast-multiply, no MXU.
    w1 = pk(PK_W1)                                          # (C1, KS)
    h = w1[:, 0:1] * x2 + w1[:, 1:2] * x1 + w1[:, 2:3] * x0 + pk(PK_B1)
    h = jnp.maximum(h, 0.0)                                 # (C1, LANES)

    # conv2: stack the KS shifted copies along sublanes -> ONE matmul.
    hs = jnp.concatenate([shift(h, 2, m2), shift(h, 1, m1), h], axis=0)
    h = jnp.maximum(mm(pk(PK_W2), hs) + pk(PK_B2), 0.0)     # (C1, LANES)

    # residual 1x1 downsample (Cin = 1): VPU broadcast.
    res = pk(PK_WD1) * x0 + pk(PK_BD1)
    o1 = jnp.maximum(h + res, 0.0)                          # (C1, LANES)

    # ----------------------- temporal block 2 (dilation 2) -------------------
    # conv3 and the 1x1 downsample2 share ONE matmul (packed (2*C2, KS*C1) wt).
    hs = jnp.concatenate([shift(o1, 4, m4), shift(o1, 2, m2), o1], axis=0)
    c3 = mm(pk(PK_W3D), hs)                                 # (2*C2, LANES)
    h = jnp.maximum(c3[0:C2, :] + pk(PK_B3), 0.0)           # conv3 output
    res = c3[C2:2 * C2, :] + pk(PK_BD2)                     # downsample2 output

    hs = jnp.concatenate([shift(h, 4, m4), shift(h, 2, m2), h], axis=0)
    h = jnp.maximum(mm(pk(PK_W4), hs) + pk(PK_B4), 0.0)     # (C2, LANES)
    h2 = jnp.maximum(h + res, 0.0)                          # (C2, LANES) == (K, LANES)

    # ------------------ fused concat + Linear (transposed out) ---------------
    # y[k, b*BLK + i] = h2[k, b*BLK + i]     for i <  INPUT_LEN (TCN columns)
    #                 = emb[b, k, i - L]     for i >= INPUT_LEN (embedding cols,
    #                                         pre-placed in emb_ref by wrapper)
    y = h2 * tcn_lane + emb_ref[...]
    out_ref[...] = mm(pk(PK_WFC), y) + pk(PK_BFC)           # (OUTPUT_LEN, LANES)


# -------------------------------- wrapper -------------------------------------
def _place(x2d):
    """(B, INPUT_LEN) -> (1, LANES): value of example b, time t at lane b*BLK+t."""
    xb = jnp.pad(x2d, ((0, 0), (0, BLK - INPUT_LEN)))        # (B, BLK)
    flat = xb.reshape(1, B * BLK)
    return jnp.pad(flat, ((0, 0), (0, LANES - B * BLK)))     # (1, LANES)


def p1_forward(pack, mkt_table, crop_table, price_x, volume_x, mkt_x, crop_x):
    """price_x/volume_x: (B, INPUT_LEN, 1) float; mkt_x/crop_x: (B, K) int32."""
    del volume_x  # unused in the reference forward
    p = price_x.astype(jnp.float32).reshape(B, INPUT_LEN)
    p1s = jnp.pad(p, ((0, 0), (1, 0)))[:, :INPUT_LEN]        # causal shift by 1
    p2s = jnp.pad(p, ((0, 0), (2, 0)))[:, :INPUT_LEN]        # causal shift by 2
    price3 = jnp.concatenate([_place(p2s), _place(p1s), _place(p)], axis=1)  # (1, 3*LANES)

    emb = jnp.concatenate([mkt_table[mkt_x], crop_table[crop_x]],
                          axis=-1).astype(jnp.float32)       # (B, K, EMB_CAT)
    embT = jnp.transpose(emb, (1, 0, 2))                     # (K, B, EMB_CAT)
    embT = jnp.pad(embT, ((0, 0), (0, 0), (INPUT_LEN, 0)))   # (K, B, BLK): vals at 8..15
    emb_pad = jnp.pad(embT.reshape(K, B * BLK),
                      ((0, 0), (0, LANES - B * BLK)))        # (K, LANES)

    out_t = pl.pallas_call(
        p1_kernel,
        out_shape=jax.ShapeDtypeStruct((OUTPUT_LEN, LANES), jnp.float32),
        grid_spec=pltpu.PrefetchScalarGridSpec(
            num_scalar_prefetch=0,
            grid=(1,),
            in_specs=[
                pl.BlockSpec((1, KS * LANES), lambda i: (0, 0)),
                pl.BlockSpec((K, LANES), lambda i: (0, 0)),
                pl.BlockSpec((PACK_R, PACK_C), lambda i: (0, 0)),
            ],
            out_specs=pl.BlockSpec((OUTPUT_LEN, LANES), lambda i: (0, 0)),
        ),
        compiler_params=pltpu.CompilerParams(dimension_semantics=("arbitrary",)),
    )(price3, emb_pad, pack)

    out = out_t[:, :B * BLK].reshape(OUTPUT_LEN, B, BLK)     # (4, B, IN_FEAT)
    return jnp.transpose(out, (1, 2, 0))                     # (B, IN_FEAT, OUTPUT_LEN)


# ------------------------- one-time weight packing -----------------------------
def pack_params(p):
    def conv_pack(w):                       # (Cout, Cin, KS) -> (Cout, KS*Cin)
        co, ci, ks = w.shape
        return jnp.transpose(w, (0, 2, 1)).reshape(co, ks * ci)

    pack = jnp.zeros((PACK_R, PACK_C), jnp.float32)

    def put(pk_arr, spec, val):
        r, nr, c, nc = spec
        return pk_arr.at[r:r + nr, c:c + nc].set(val.reshape(nr, nc))

    pack = put(pack, PK_W1, p["w1"][:, 0, :])
    pack = put(pack, PK_B1, p["b1"])
    pack = put(pack, PK_WD1, p["wd1"])
    pack = put(pack, PK_BD1, p["bd1"])
    pack = put(pack, PK_B2, p["b2"])
    pack = put(pack, PK_W2, conv_pack(p["w2"]))
    # conv3 + downsample2 fused: downsample2 multiplies the un-shifted (tap-2) block.
    w3d = jnp.concatenate(
        [conv_pack(p["w3"]),
         jnp.concatenate([jnp.zeros((C2, 2 * C1), jnp.float32), p["wd2"]], axis=1)],
        axis=0)                                              # (2*C2, KS*C1)
    pack = put(pack, PK_W3D, w3d)
    pack = put(pack, PK_B3, p["b3"])
    pack = put(pack, PK_BD2, p["bd2"])
    pack = put(pack, PK_B4, p["b4"])
    pack = put(pack, PK_W4, conv_pack(p["w4"]))
    pack = put(pack, PK_WFC, p["wfc"])
    pack = put(pack, PK_BFC, p["bfc"])
    return pack


# --------------------------- deterministic params -----------------------------
def init_params():
    key = jax.random.PRNGKey(42)
    ks = jax.random.split(key, 16)

    def nrm(k, shape, fan_in):
        return jax.random.normal(k, shape, jnp.float32) / jnp.sqrt(float(fan_in))

    return {
        # conv weights in torch layout (Cout, Cin, KS); biases (Cout,)
        "w1": nrm(ks[0], (C1, 1, KS), KS),        "b1": nrm(ks[1], (C1,), C1),
        "w2": nrm(ks[2], (C1, C1, KS), C1 * KS),  "b2": nrm(ks[3], (C1,), C1),
        "wd1": nrm(ks[4], (C1, 1), 1),            "bd1": nrm(ks[5], (C1,), C1),
        "w3": nrm(ks[6], (C2, C1, KS), C1 * KS),  "b3": nrm(ks[7], (C2,), C2),
        "w4": nrm(ks[8], (C2, C2, KS), C2 * KS),  "b4": nrm(ks[9], (C2,), C2),
        "wd2": nrm(ks[10], (C2, C1), C1),         "bd2": nrm(ks[11], (C2,), C2),
        "wfc": nrm(ks[12], (OUTPUT_LEN, IN_FEAT), IN_FEAT),
        "bfc": nrm(ks[13], (OUTPUT_LEN,), 1),
        "mkt_table": nrm(ks[14], (MKT_NUM, MKT_EMB_DIM), MKT_EMB_DIM),
        "crop_table": nrm(ks[15], (CROP_NUM, CROP_EMB_DIM), CROP_EMB_DIM),
    }


# ------------------------------ pure-JAX reference ----------------------------
def _ref_causal_conv(x, w, b, dilation):
    # x: (B, Cin, L); w: torch Conv1d layout (Cout, Cin, KS) + Chomp1d
    pad = (KS - 1) * dilation
    y = lax.conv_general_dilated(x, w, window_strides=(1,), padding=[(pad, pad)],
                                 rhs_dilation=(dilation,),
                                 dimension_numbers=("NCH", "OIH", "NCH"))
    return y[:, :, : x.shape[-1]] + b.reshape(1, -1, 1)


def ref_forward(p, price_x, mkt_x, crop_x):
    x = jnp.transpose(price_x.astype(jnp.float32), (0, 2, 1))     # (B, 1, L)

    def block(x, wa, ba, wb, bb, wd, bd, d):
        h = jax.nn.relu(_ref_causal_conv(x, wa, ba, d))
        h = jax.nn.relu(_ref_causal_conv(h, wb, bb, d))
        res = jnp.einsum("oi,bil->bol", wd, x) + bd.reshape(1, -1, 1)
        return jax.nn.relu(h + res)

    h = block(x, p["w1"], p["b1"], p["w2"], p["b2"], p["wd1"], p["bd1"], 1)
    h = block(h, p["w3"], p["b3"], p["w4"], p["b4"], p["wd2"], p["bd2"], 2)
    price_y = jnp.transpose(h, (0, 2, 1))                         # (B, L, C2)
    em = jnp.transpose(p["mkt_table"][mkt_x], (0, 2, 1))          # (B, 4, K)
    ec = jnp.transpose(p["crop_table"][crop_x], (0, 2, 1))        # (B, 4, K)
    y = jnp.concatenate([price_y, em, ec], axis=1)                # (B, IN_FEAT, K)
    return jnp.einsum("bik,ok->bio", y, p["wfc"]) + p["bfc"].reshape(1, 1, -1)


# ----------------------------------- main --------------------------------------
if __name__ == "__main__":
    params = init_params()
    pack = jax.block_until_ready(pack_params(params))   # one-time weight packing

    key = jax.random.PRNGKey(0)
    k1, k2, k3, k4 = jax.random.split(key, 4)
    price_x = jax.random.normal(k1, (B, INPUT_LEN, 1), jnp.float32)
    volume_x = jax.random.normal(k2, (B, INPUT_LEN, 1), jnp.float32)   # unused
    mkt_x = jax.random.randint(k3, (B, K), 0, MKT_NUM, jnp.int32)
    crop_x = jax.random.randint(k4, (B, K), 0, CROP_NUM, jnp.int32)

    out = p1_forward(pack, params["mkt_table"], params["crop_table"],
                     price_x, volume_x, mkt_x, crop_x)
    out = jax.block_until_ready(out)

    ref = jax.block_until_ready(ref_forward(params, price_x, mkt_x, crop_x))

    assert out.shape == (B, IN_FEAT, OUTPUT_LEN), out.shape
    assert bool(jnp.all(jnp.isfinite(out)))
    err = float(jnp.max(jnp.abs(out - ref)))
    assert bool(jnp.allclose(out, ref, atol=2e-4, rtol=2e-4)), err

    # TODO(synk): training-mode dropout inside the TCN is eval-mode identity and
    # weight_norm is folded into plain conv weights; fit()/optimizer is out of scope.
    print("KERNEL_OK")
</pallas_src>

<mosaic_0001>
module attributes {stable_mosaic.version = 11 : i64} {
  func.func @p1_kernel(%arg0: i32, %arg1: memref<1x384xf32, #tpu.memory_space<vmem>>, %arg2: memref<16x128xf32, #tpu.memory_space<vmem>>, %arg3: memref<64x64xf32, #tpu.memory_space<vmem>>, %arg4: memref<4x128xf32, #tpu.memory_space<vmem>>) attributes {dimension_semantics = [#tpu.dimension_semantics<arbitrary>], iteration_bounds = array<i64: 1>, scalar_prefetch = 0 : i64, scratch_operands = 0 : i64, tpu.core_type = #tpu.core_type<tc>, window_params = [{pipeline_mode = #tpu.pipeline_mode<synchronous>, transform_indices = @transform_0, window_bounds = array<i64: 1, 384>}, {pipeline_mode = #tpu.pipeline_mode<synchronous>, transform_indices = @transform_1, window_bounds = array<i64: 16, 128>}, {pipeline_mode = #tpu.pipeline_mode<synchronous>, transform_indices = @transform_2, window_bounds = array<i64: 64, 64>}, {pipeline_mode = #tpu.pipeline_mode<synchronous>, transform_indices = @transform_3, window_bounds = array<i64: 4, 128>}]} {
    %0 = tpu.iota {dimensions = array<i32: 1>} : vector<1x128xi32>
    %c15_i32 = arith.constant 15 : i32
    %1 = vector.broadcast %c15_i32 : i32 to vector<1x128xi32>
    %2 = arith.andi %0, %1 : vector<1x128xi32>
    %c1_i32 = arith.constant 1 : i32
    %3 = vector.broadcast %c1_i32 : i32 to vector<1x128xi32>
    %4 = arith.cmpi sge, %2, %3 : vector<1x128xi32>
    %5 = arith.extui %4 : vector<1x128xi1> to vector<1x128xi32>
    %6 = arith.sitofp %5 : vector<1x128xi32> to vector<1x128xf32>
    %c2_i32 = arith.constant 2 : i32
    %7 = vector.broadcast %c2_i32 : i32 to vector<1x128xi32>
    %8 = arith.cmpi sge, %2, %7 : vector<1x128xi32>
    %9 = arith.extui %8 : vector<1x128xi1> to vector<1x128xi32>
    %10 = arith.sitofp %9 : vector<1x128xi32> to vector<1x128xf32>
    %c4_i32 = arith.constant 4 : i32
    %11 = vector.broadcast %c4_i32 : i32 to vector<1x128xi32>
    %12 = arith.cmpi sge, %2, %11 : vector<1x128xi32>
    %13 = arith.extui %12 : vector<1x128xi1> to vector<1x128xi32>
    %14 = arith.sitofp %13 : vector<1x128xi32> to vector<1x128xf32>
    %c8_i32 = arith.constant 8 : i32
    %15 = vector.broadcast %c8_i32 : i32 to vector<1x128xi32>
    %16 = arith.cmpi slt, %2, %15 : vector<1x128xi32>
    %c32_i32 = arith.constant 32 : i32
    %17 = vector.broadcast %c32_i32 : i32 to vector<1x128xi32>
    %18 = arith.cmpi slt, %0, %17 : vector<1x128xi32>
    %19 = arith.andi %16, %18 : vector<1x128xi1>
    %20 = arith.extui %19 : vector<1x128xi1> to vector<1x128xi32>
    %21 = arith.sitofp %20 : vector<1x128xi32> to vector<1x128xf32>
    %c0 = arith.constant 0 : index
    %c0_0 = arith.constant 0 : index
    %22 = vector.load %arg1[%c0, %c0_0] : memref<1x384xf32, #tpu.memory_space<vmem>>, vector<1x128xf32>
    %c0_1 = arith.constant 0 : index
    %c128 = arith.constant 128 : index
    %23 = vector.load %arg1[%c0_1, %c128] : memref<1x384xf32, #tpu.memory_space<vmem>>, vector<1x128xf32>
    %c0_2 = arith.constant 0 : index
    %c256 = arith.constant 256 : index
    %24 = vector.load %arg1[%c0_2, %c256] : memref<1x384xf32, #tpu.memory_space<vmem>>, vector<1x128xf32>
    %c0_3 = arith.constant 0 : index
    %c0_4 = arith.constant 0 : index
    %25 = vector.load %arg3[%c0_3, %c0_4] : memref<64x64xf32, #tpu.memory_space<vmem>>, vector<8x3xf32>
    %26 = vector.extract_strided_slice %25 {offsets = [0, 0], sizes = [8, 1], strides = [1, 1]} : vector<8x3xf32> to vector<8x1xf32>
    %27 = vector.broadcast %26 : vector<8x1xf32> to vector<8x128xf32>
    %28 = vector.broadcast %22 : vector<1x128xf32> to vector<8x128xf32>
    %29 = arith.mulf %27, %28 : vector<8x128xf32>
    %30 = vector.extract_strided_slice %25 {offsets = [0, 1], sizes = [8, 1], strides = [1, 1]} : vector<8x3xf32> to vector<8x1xf32>
    %31 = vector.broadcast %30 : vector<8x1xf32> to vector<8x128xf32>
    %32 = vector.broadcast %23 : vector<1x128xf32> to vector<8x128xf32>
    %33 = arith.mulf %31, %32 : vector<8x128xf32>
    %34 = arith.addf %29, %33 : vector<8x128xf32>
    %35 = vector.extract_strided_slice %25 {offsets = [0, 2], sizes = [8, 1], strides = [1, 1]} : vector<8x3xf32> to vector<8x1xf32>
    %36 = vector.broadcast %35 : vector<8x1xf32> to vector<8x128xf32>
    %37 = vector.broadcast %24 : vector<1x128xf32> to vector<8x128xf32>
    %38 = arith.mulf %36, %37 : vector<8x128xf32>
    %39 = arith.addf %34, %38 : vector<8x128xf32>
    %c0_5 = arith.constant 0 : index
    %c3 = arith.constant 3 : index
    %40 = vector.load %arg3[%c0_5, %c3] : memref<64x64xf32, #tpu.memory_space<vmem>>, vector<8x1xf32>
    %41 = vector.broadcast %40 : vector<8x1xf32> to vector<8x128xf32>
    %42 = arith.addf %39, %41 : vector<8x128xf32>
    %cst = arith.constant 0.000000e+00 : f32
    %43 = vector.broadcast %cst : f32 to vector<8x128xf32>
    %44 = arith.maximumf %42, %43 : vector<8x128xf32>
    %c2_i32_6 = arith.constant 2 : i32
    %45 = tpu.dynamic_rotate %44 by %c2_i32_6 dim 1 : vector<8x128xf32>, i32 -> vector<8x128xf32>
    %46 = vector.broadcast %10 : vector<1x128xf32> to vector<8x128xf32>
    %47 = arith.mulf %45, %46 : vector<8x128xf32>
    %c1_i32_7 = arith.constant 1 : i32
    %48 = tpu.dynamic_rotate %44 by %c1_i32_7 dim 1 : vector<8x128xf32>, i32 -> vector<8x128xf32>
    %49 = vector.broadcast %6 : vector<1x128xf32> to vector<8x128xf32>
    %50 = arith.mulf %48, %49 : vector<8x128xf32>
    %51 = tpu.concatenate %47, %50, %44 in 0 : vector<8x128xf32>, vector<8x128xf32>, vector<8x128xf32> -> vector<24x128xf32>
    %c8 = arith.constant 8 : index
    %c0_8 = arith.constant 0 : index
    %52 = vector.load %arg3[%c8, %c0_8] : memref<64x64xf32, #tpu.memory_space<vmem>>, vector<8x24xf32>
    %cst_9 = arith.constant dense<0.000000e+00> : vector<8x128xf32>
    %53 = tpu.matmul %52, %51, %cst_9 {dimension_numbers = #tpu.dot_dimension_numbers<[1], [0], [0], [1], [0, 0, 1, 1], [], []>} : vector<8x24xf32>, vector<24x128xf32>, vector<8x128xf32> -> vector<8x128xf32>
    %c0_10 = arith.constant 0 : index
    %c6 = arith.constant 6 : index
    %54 = vector.load %arg3[%c0_10, %c6] : memref<64x64xf32, #tpu.memory_space<vmem>>, vector<8x1xf32>
    %55 = vector.broadcast %54 : vector<8x1xf32> to vector<8x128xf32>
    %56 = arith.addf %53, %55 : vector<8x128xf32>
    %cst_11 = arith.constant 0.000000e+00 : f32
    %57 = vector.broadcast %cst_11 : f32 to vector<8x128xf32>
    %58 = arith.maximumf %56, %57 : vector<8x128xf32>
    %c0_12 = arith.constant 0 : index
    %c4 = arith.constant 4 : index
    %59 = vector.load %arg3[%c0_12, %c4] : memref<64x64xf32, #tpu.memory_space<vmem>>, vector<8x1xf32>
    %60 = vector.broadcast %59 : vector<8x1xf32> to vector<8x128xf32>
    %61 = vector.broadcast %24 : vector<1x128xf32> to vector<8x128xf32>
    %62 = arith.mulf %60, %61 : vector<8x128xf32>
    %c0_13 = arith.constant 0 : index
    %c5 = arith.constant 5 : index
    %63 = vector.load %arg3[%c0_13, %c5] : memref<64x64xf32, #tpu.memory_space<vmem>>, vector<8x1xf32>
    %64 = vector.broadcast %63 : vector<8x1xf32> to vector<8x128xf32>
    %65 = arith.addf %62, %64 : vector<8x128xf32>
    %66 = arith.addf %58, %65 : vector<8x128xf32>
    %cst_14 = arith.constant 0.000000e+00 : f32
    %67 = vector.broadcast %cst_14 : f32 to vector<8x128xf32>
    %68 = arith.maximumf %66, %67 : vector<8x128xf32>
    %c4_i32_15 = arith.constant 4 : i32
    %69 = tpu.dynamic_rotate %68 by %c4_i32_15 dim 1 : vector<8x128xf32>, i32 -> vector<8x128xf32>
    %70 = vector.broadcast %14 : vector<1x128xf32> to vector<8x128xf32>
    %71 = arith.mulf %69, %70 : vector<8x128xf32>
    %c2_i32_16 = arith.constant 2 : i32
    %72 = tpu.dynamic_rotate %68 by %c2_i32_16 dim 1 : vector<8x128xf32>, i32 -> vector<8x128xf32>
    %73 = vector.broadcast %10 : vector<1x128xf32> to vector<8x128xf32>
    %74 = arith.mulf %72, %73 : vector<8x128xf32>
    %75 = tpu.concatenate %71, %74, %68 in 0 : vector<8x128xf32>, vector<8x128xf32>, vector<8x128xf32> -> vector<24x128xf32>
    %c16 = arith.constant 16 : index
    %c0_17 = arith.constant 0 : index
    %76 = vector.load %arg3[%c16, %c0_17] : memref<64x64xf32, #tpu.memory_space<vmem>>, vector<32x24xf32>
    %cst_18 = arith.constant dense<0.000000e+00> : vector<32x128xf32>
    %77 = tpu.matmul %76, %75, %cst_18 {dimension_numbers = #tpu.dot_dimension_numbers<[1], [0], [0], [1], [0, 0, 1, 1], [], []>} : vector<32x24xf32>, vector<24x128xf32>, vector<32x128xf32> -> vector<32x128xf32>
    %78 = vector.extract_strided_slice %77 {offsets = [0, 0], sizes = [16, 128], strides = [1, 1]} : vector<32x128xf32> to vector<16x128xf32>
    %c16_19 = arith.constant 16 : index
    %c24 = arith.constant 24 : index
    %79 = vector.load %arg3[%c16_19, %c24] : memref<64x64xf32, #tpu.memory_space<vmem>>, vector<16x1xf32>
    %80 = vector.broadcast %79 : vector<16x1xf32> to vector<16x128xf32>
    %81 = arith.addf %78, %80 : vector<16x128xf32>
    %cst_20 = arith.constant 0.000000e+00 : f32
    %82 = vector.broadcast %cst_20 : f32 to vector<16x128xf32>
    %83 = arith.maximumf %81, %82 : vector<16x128xf32>
    %84 = vector.extract_strided_slice %77 {offsets = [16, 0], sizes = [16, 128], strides = [1, 1]} : vector<32x128xf32> to vector<16x128xf32>
    %c16_21 = arith.constant 16 : index
    %c25 = arith.constant 25 : index
    %85 = vector.load %arg3[%c16_21, %c25] : memref<64x64xf32, #tpu.memory_space<vmem>>, vector<16x1xf32>
    %86 = vector.broadcast %85 : vector<16x1xf32> to vector<16x128xf32>
    %87 = arith.addf %84, %86 : vector<16x128xf32>
    %c4_i32_22 = arith.constant 4 : i32
    %88 = tpu.dynamic_rotate %83 by %c4_i32_22 dim 1 : vector<16x128xf32>, i32 -> vector<16x128xf32>
    %89 = vector.broadcast %14 : vector<1x128xf32> to vector<16x128xf32>
    %90 = arith.mulf %88, %89 : vector<16x128xf32>
    %c2_i32_23 = arith.constant 2 : i32
    %91 = tpu.dynamic_rotate %83 by %c2_i32_23 dim 1 : vector<16x128xf32>, i32 -> vector<16x128xf32>
    %92 = vector.broadcast %10 : vector<1x128xf32> to vector<16x128xf32>
    %93 = arith.mulf %91, %92 : vector<16x128xf32>
    %94 = tpu.concatenate %90, %93, %83 in 0 : vector<16x128xf32>, vector<16x128xf32>, vector<16x128xf32> -> vector<48x128xf32>
    %c48 = arith.constant 48 : index
    %c0_24 = arith.constant 0 : index
    %95 = vector.load %arg3[%c48, %c0_24] : memref<64x64xf32, #tpu.memory_space<vmem>>, vector<16x48xf32>
    %cst_25 = arith.constant dense<0.000000e+00> : vector<16x128xf32>
    %96 = tpu.matmul %95, %94, %cst_25 {dimension_numbers = #tpu.dot_dimension_numbers<[1], [0], [0], [1], [0, 0, 1, 1], [], []>} : vector<16x48xf32>, vector<48x128xf32>, vector<16x128xf32> -> vector<16x128xf32>
    %c32 = arith.constant 32 : index
    %c24_26 = arith.constant 24 : index
    %97 = vector.load %arg3[%c32, %c24_26] : memref<64x64xf32, #tpu.memory_space<vmem>>, vector<16x1xf32>
    %98 = vector.broadcast %97 : vector<16x1xf32> to vector<16x128xf32>
    %99 = arith.addf %96, %98 : vector<16x128xf32>
    %cst_27 = arith.constant 0.000000e+00 : f32
    %100 = vector.broadcast %cst_27 : f32 to vector<16x128xf32>
    %101 = arith.maximumf %99, %100 : vector<16x128xf32>
    %102 = arith.addf %101, %87 : vector<16x128xf32>
    %cst_28 = arith.constant 0.000000e+00 : f32
    %103 = vector.broadcast %cst_28 : f32 to vector<16x128xf32>
    %104 = arith.maximumf %102, %103 : vector<16x128xf32>
    %105 = vector.broadcast %21 : vector<1x128xf32> to vector<16x128xf32>
    %106 = arith.mulf %104, %105 : vector<16x128xf32>
    %c0_29 = arith.constant 0 : index
    %c0_30 = arith.constant 0 : index
    %107 = vector.load %arg2[%c0_29, %c0_30] : memref<16x128xf32, #tpu.memory_space<vmem>>, vector<16x128xf32>
    %108 = arith.addf %106, %107 : vector<16x128xf32>
    %c48_31 = arith.constant 48 : index
    %c48_32 = arith.constant 48 : index
    %109 = vector.load %arg3[%c48_31, %c48_32] : memref<64x64xf32, #tpu.memory_space<vmem>>, vector<4x16xf32>
    %cst_33 = arith.constant dense<0.000000e+00> : vector<4x128xf32>
    %110 = tpu.matmul %109, %108, %cst_33 {dimension_numbers = #tpu.dot_dimension_numbers<[1], [0], [0], [1], [0, 0, 1, 1], [], []>} : vector<4x16xf32>, vector<16x128xf32>, vector<4x128xf32> -> vector<4x128xf32>
    %c56 = arith.constant 56 : index
    %c48_34 = arith.constant 48 : index
    %111 = vector.load %arg3[%c56, %c48_34] : memref<64x64xf32, #tpu.memory_space<vmem>>, vector<4x1xf32>
    %112 = vector.broadcast %111 : vector<4x1xf32> to vector<4x128xf32>
    %113 = arith.addf %110, %112 : vector<4x128xf32>
    %c0_35 = arith.constant 0 : index
    %c0_36 = arith.constant 0 : index
    %114 = vector.load %arg4[%c0_35, %c0_36] : memref<4x128xf32, #tpu.memory_space<vmem>>, vector<4x128xf32>
    tpu.vector_store %arg4[%c0_35, %c0_36], %113 {strides = array<i32>} : memref<4x128xf32, #tpu.memory_space<vmem>>, vector<4x128xf32>,
    return
  }
  func.func @transform_0(%arg0: i32) -> (i32, i32) {
    %c0_i32 = arith.constant 0 : i32
    %c0_i32_0 = arith.constant 0 : i32
    %c0_i32_1 = arith.constant 0 : i32
    return %c0_i32, %c0_i32_0 : i32, i32
  }
  func.func @transform_1(%arg0: i32) -> (i32, i32) {
    %c0_i32 = arith.constant 0 : i32
    %c0_i32_0 = arith.constant 0 : i32
    %c0_i32_1 = arith.constant 0 : i32
    return %c0_i32, %c0_i32_0 : i32, i32
  }
  func.func @transform_2(%arg0: i32) -> (i32, i32) {
    %c0_i32 = arith.constant 0 : i32
    %c0_i32_0 = arith.constant 0 : i32
    %c0_i32_1 = arith.constant 0 : i32
    return %c0_i32, %c0_i32_0 : i32, i32
  }
  func.func @transform_3(%arg0: i32) -> (i32, i32) {
    %c0_i32 = arith.constant 0 : i32
    %c0_i32_0 = arith.constant 0 : i32
    %c0_i32_1 = arith.constant 0 : i32
    return %c0_i32, %c0_i32_0 : i32, i32
  }
}

</mosaic_0001>

<bundles_post_ra>
// kernel: tpu_custom_call.1
= control target key start
LH: loop header
LB: loop body
LE: loop exit
PB: predicated region body
PF: predicated region fallthrough
CT: control target
= control target key end

     0   :  { %8 = vsyncpa [#allocation3], 0  ;;  %s595_s0 = inlined_call_operand.hbm [shape: f32[1,384], index: 0, kind: input, shape index: {}]   ;;  %s596_s1 = inlined_call_operand.hbm [shape: f32[16,128], index: 1, kind: input, shape index: {}]   ;;  %s597_s2 = inlined_call_operand.hbm [shape: f32[64,64], index: 2, kind: input, shape index: {}]   ;;  %s598_s3 = inlined_call_operand.hbm [shape: f32[4,128], index: 3, kind: output, shape index: {}]  }
   0x1   :  { %9 = vsyncpa [#allocation6], 0  ;;  %s26_s14 = sshll.u32 %s596_s1, 4  ;;  %s27_s14 = int_to_ptr.hbm [resolvable:$true] %s26_s14 }
   0x2   :  { %10 = vsyncpa [#allocation4], 0  ;;  %s510_s15 = smov [#allocation5]   ;;  %s16_s19 = sshll.u32 %s595_s0, 4  ;;  %s17_s19 = int_to_ptr.hbm [resolvable:$true] %s16_s19 }
   0x3   :  { %s28_s16 = sshll.u32 %s510_s15, 4  ;;  %s511_s20 = smov 128   ;;  %s29_s16 = int_to_ptr.vmem [resolvable:$true] %s28_s16 }
   0x4   :  { %s512_s21 = smov 8   ;;  %s513_s22 = smov [#allocation2]  }
   0x5   :  { %34 = dma.hbm_to_vmem [thread:$0]  %s27_s14, 256, %s29_s16, [#allocation6], %s511_s20, %s511_s20, %s512_s21  }
   0x6   :  { %s18_s23 = sshll.u32 %s513_s22, 4  ;;  %s39_s26 = sshll.u32 %s597_s2, 4  ;;  %s19_s23 = int_to_ptr.vmem [resolvable:$true] %s18_s23  ;;  %s40_s26 = int_to_ptr.hbm [resolvable:$true] %s39_s26 }
   0x7   :  { %21 = dma.hbm_to_vmem [thread:$0]  %s17_s19, 48, %s19_s23, [#allocation3]  }
   0x8   :  { %s514_s1 = smov [#allocation7]  }
   0x9   :  { %s41_s27 = sshll.u32 %s514_s1, 4  ;;  %s42_s27 = int_to_ptr.vmem [resolvable:$true] %s41_s27 }
   0xa   :  { %47 = dma.hbm_to_vmem [thread:$0]  %s40_s26, 1024, %s42_s27, [#allocation6], %s511_s20, %s511_s20, %s512_s21  }
   0xb   :  { %504 = dma.done.wait [#allocation3], 48  }
   0xc   :  { %505 = vsyncadd [#allocation3], 4294967248 }
   0xd   :  { %506 = dma.done.wait [#allocation6], 1280  }
   0xe   :  { %507 = vsyncadd [#allocation6], 4294966016  ;;  %v515_v0 = vmov 0   ;;  %v516_v1 = vmov 2   ;;  %v80_v2 = vld [vmem:[#allocation7] sm:$0xff]  ;;  %v517_v3 = vmov 1   ;;  %v60_v21 = vlaneseq }
   0xf   :  { %391 = vset.pattern.permute.xlu0 %v515_v0  ;;  %393 = vset.pattern.permute.xlu1 %v516_v1  ;;  %v518_v4 = vmov 3   ;;  %v405_v7 = vld [vmem:[#allocation2] ss:$0 sm:$0xff]  ;;  %v407_v8 = vld [vmem:[#allocation2 + $0x1] ss:$0 sm:$0xff]  ;;  %s519_s0 = smov 1  }
  0x10   :  { %83 = vperm.xlu0 %391, %v80_v2   ;;  %100 = vperm.xlu1 %393, %v80_v2   ;;  %v406_v9 = vld [vmem:[#allocation2 + $0x2] ss:$0 sm:$0xff]  ;;  %s520_s2 = smov 2   ;;  %v521_v19 = vmov 6   ;;  %v522_v20 = vmov 5   ;;  %v523_v22 = vmov 4  }
  0x11   :  { %396 = vset.pattern.permute.xlu2 %v523_v22  ;;  %v561_v23 = vand.u32 127, %v60_v21  ;;  %v524_v25 = vmov 0.0   ;;  %v120_v32 = vld [vmem:[#allocation7 + $0x8] sm:$0xff]  ;;  %vm125_vm2 = vcmask 195584   ;;  %s525_s28 = smov 4   ;;  %v168_v43 = vld [vmem:[#allocation7 + $0x10] sm:$0xff] }
  0x12   :  { %v169_v44 = vld [vmem:[#allocation7 + $0x18] sm:$0xff]  ;;  %v526_v45 = vmov 24   ;;  %v171_v51 = vld [vmem:[#allocation7 + $0x28] sm:$0xff]  ;;  %v170_v60 = vld [vmem:[#allocation7 + $0x20] sm:$0xff]  ;;  %v527_v61 = vmov 25   ;;  %s528_s29 = smov 80  }
  0x13   :  { %v564_v24 = vand.u32 15, %v561_v23  ;;  %v303_v62 = vld [vmem:[#allocation7 + $0x30] sm:$0xf]  ;;  %vm261_vm4 = vcmask 392192   ;;  %vm73_vm6 = vcmp.lt.s32.totalorder %v561_v23, 32  ;;  %vm313_vm8 = vcmask 130048  }
  0x14   :  { %s530_s30 = smov [#allocation8]   ;;  %s344_s7 = sshll.u32 %s598_s3, 4  ;;  %s345_s7 = int_to_ptr.hbm [resolvable:$true] %s344_s7 }
  0x15   :  { %vm63_vm0 = vcmp.ge.s32.totalorder %v564_v24, 1  ;;  %vm66_vm1 = vcmp.ge.s32.totalorder %v564_v24, 2  ;;  %vm69_vm3 = vcmp.ge.s32.totalorder %v564_v24, 4  ;;  %vm72_vm5 = vcmp.lt.s32.totalorder %v564_v24, 8  ;;  %s342_s4 = sshll.u32 %s530_s30, 4  ;;  %s343_s4 = int_to_ptr.vmem [resolvable:$true] %s342_s4 }
  0x16   :  { %v355_v26 = vsel %vm63_vm0, 1.0, %v524_v25  ;;  %v570_v29 = vsel %vm66_vm1, 1.0, %v524_v25  ;;  %v357_v46 = vsel %vm69_vm3, 1.0, %v524_v25  ;;  %vm74_vm7 = vmand %vm72_vm5, %vm73_vm6 }
  0x18   :  { %392 = vset.pattern.permute.xlu0 %v517_v3  ;;  %394 = vset.pattern.permute.xlu1 %v518_v4 }
  0x19   :  { %91 = vperm.xlu0 %392, %v80_v2   ;;  %109 = vperm.xlu1 %394, %v80_v2  }
  0x21   :  { %395 = vset.pattern.permute.xlu1 %v521_v19  ;;  %397 = vset.pattern.permute.xlu0 %v522_v20 }
  0x22   :  { %122 = vperm.xlu1 %395, %v80_v2   ;;  %156 = vperm.xlu0 %397, %v80_v2  }
  0x2a   :  { %398 = vset.pattern.permute.xlu1 %v526_v45  ;;  %401 = vset.pattern.permute.xlu0 %v526_v45 }
  0x82   :  { %v84_v5 = vpop.permute.xlu0 %83  ;;  %v101_v6 = vpop.permute.xlu1 %100 }
  0x83   :  { %v89_v11 = vmul.f32 %v405_v7, %v84_v5  ;;  %v106_v13 = vmul.f32 %v406_v9, %v101_v6  ;;  %v251_v7 = vld [vmem:[#allocation7 + $0x30] sm:$0xff] }
  0x8b   :  { %v92_v10 = vpop.permute.xlu0 %91  ;;  %v110_v15 = vpop.permute.xlu1 %109 }
  0x8c   :  { %v97_v12 = vmul.f32 %v407_v8, %v92_v10  ;;  %v252_v8 = vld [vmem:[#allocation7 + $0x38] sm:$0xff]  ;;  %v529_v10 = vmov 48  }
  0x8e   :  { %v98_v14 = vadd.f32 %v97_v12, %v89_v11 }
  0x90   :  { %v107_v16 = vadd.f32 %v106_v13, %v98_v14 }
  0x92   :  { %v112_v17 = vadd.f32 %v110_v15, %v107_v16 }
  0x94   :  { %v113_v18 = vmax.f32 %v112_v17, 0.0  ;;  %v123_v35 = vpop.permute.xlu1 %122  ;;  %v157_v36 = vpop.permute.xlu0 %156 }
  0x96   :  { %117 = vrot.lane.b32.xlu2 %v113_v18, %s519_s0  ;;  %142 = vmatpush.msra.mxu0 %v113_v18 }
  0x9e   :  { %114 = vrot.lane.b32.xlu2 %v113_v18, %s520_s2 }
  0xa6   :  { %151 = vperm.xlu2 %396, %v80_v2  }
  0xae   :  { %399 = vset.pattern.permute.xlu2 %v526_v45 }
  0xf0   :  { %v118_v27 = vpop.permute.xlu2 %117 }
  0xf1   :  { %v119_v28 = vmul.f32 %v355_v26, %v118_v27 }
  0xf3   :  { %143 = vmatpush.msra.mxu0 %v119_v28 }
  0xf8   :  { %v115_v30 = vpop.permute.xlu2 %114 }
  0xf9   :  { %v116_v31 = vmul.f32 %v570_v29, %v115_v30 }
  0xfb   :  { %144 = vmatpush.msra.mxu0 %v116_v31  ;;  %v358_v31 = vsel %vm74_vm7, 1.0, %v524_v25 }
  0xfc   :  { %359 = vmatmul.msk.f32.vlgmr.msra.gmra.mxu0 %vm125_vm2, %v120_v32 }
 0x100   :  { %v152_v33 = vpop.permute.xlu2 %151 }
 0x101   :  { %v154_v34 = vmul.f32 %v406_v9, %v152_v33  ;;  %v304_v9 = vld [vmem:[#allocation7 + $0x38] sm:$0xf] }
 0x102   :  { %v300_v33 = vld [vmem:[#allocation5 + $0x8] sm:$0xff] }
 0x103   :  { %v159_v39 = vadd.f32 %v157_v36, %v154_v34  ;;  %v299_v36 = vld [vmem:[#allocation5] sm:$0xff] }
 0x179   :  { %v146_v37 = vpop.f32.mrf.mxu0 }
 0x17a   :  { %v147_v38 = vadd.f32 %v146_v37, %v123_v35 }
 0x17c   :  { %v149_v40 = vmax.f32 %v147_v38, 0.0 }
 0x17e   :  { %v160_v41 = vadd.f32 %v159_v39, %v149_v40 }
 0x180   :  { %v161_v42 = vmax.f32 %v160_v41, 0.0 }
 0x182   :  { %162 = vrot.lane.b32.xlu2 %v161_v42, %s525_s28  ;;  %165 = vrot.lane.b32.xlu1 %v161_v42, %s520_s2 }
 0x183   :  { %197 = vmatpush.msra.mxu1 %v161_v42  ;;  %367 = vmatpush.msra.mxu3 %v161_v42 }
 0x18a   :  { %222 = vperm.xlu1 %398, %v169_v44   ;;  %217 = vperm.xlu2 %399, %v168_v43  }
 0x192   :  { %400 = vset.pattern.permute.xlu2 %v527_v61 }
 0x1dc   :  { %v163_v47 = vpop.permute.xlu2 %162 }
 0x1dd   :  { %v164_v50 = vmul.f32 %v357_v46, %v163_v47 }
 0x1e4   :  { %v218_v52 = vpop.permute.xlu2 %217 }
 0x1f4   :  { %v166_v48 = vpop.permute.xlu1 %165 }
 0x1f5   :  { %v167_v49 = vmul.f32 %v570_v29, %v166_v48 }
 0x1f7   :  { %198 = vmatpush.msra.mxu1 %v167_v49  ;;  %368 = vmatpush.msra.mxu3 %v167_v49 }
 0x1f9   :  { %199 = vmatpush.msra.mxu1 %v164_v50  ;;  %369 = vmatpush.msra.mxu3 %v164_v50 }
 0x1fa   :  { %360 = vmatmul.msk.f32.vlgmr.msra.gmra.mxu1 %vm125_vm2, %v168_v43  ;;  %363 = vmatmul.msk.f32.vlgmr.msra.gmra.mxu3 %vm125_vm2, %v171_v51 }
 0x1fc   :  { %v223_v56 = vpop.permute.xlu1 %222 }
 0x202   :  { %361 = vmatmul.msk.f32.gmra.mxu1 %vm125_vm2, %v169_v44 }
 0x20a   :  { %362 = vmatmul.msk.f32.gmra.mxu1 %vm125_vm2, %v170_v60 }
 0x277   :  { %v201_v53 = vpop.f32.mrf.mxu1 }
 0x278   :  { %v225_v54 = vadd.f32 %v218_v52, %v201_v53 }
 0x27a   :  { %v227_v55 = vmax.f32 %v225_v54, 0.0 }
 0x27c   :  { %245 = vrot.lane.b32.xlu1 %v227_v55, %s520_s2 }
 0x27d   :  { %v210_v19 = vpop.f32.mrf.mxu3 }
 0x27f   :  { %v204_v57 = vpop.f32.mrf.mxu1 }
 0x280   :  { %v226_v58 = vadd.f32 %v223_v56, %v204_v57 }
 0x282   :  { %v228_v59 = vmax.f32 %v226_v58, 0.0 }
 0x284   :  { %258 = vperm.xlu1 %398, %v171_v51   ;;  %241 = vrot.lane.b32.xlu2 %v228_v59, %s525_s28 }
 0x285   :  { %247 = vrot.lane.b32.xlu0 %v228_v59, %s520_s2  ;;  %278 = vmatpush.msra.mxu2 %v228_v59 }
 0x287   :  { %279 = vmatpush.msra.mxu2 %v227_v55  ;;  %v207_v16 = vpop.f32.mrf.mxu1 }
 0x28c   :  { %402 = vset.pattern.permute.xlu1 %v527_v61  ;;  %234 = vperm.xlu2 %400, %v169_v44  }
 0x28d   :  { %239 = vrot.lane.b32.xlu0 %v227_v55, %s525_s28  ;;  %230 = vperm.xlu1 %402, %v168_v43  }
 0x294   :  { %311 = vrot.lane.b32.xlu2 %v303_v62, %s528_s29 }
 0x295   :  { %254 = vperm.xlu0 %401, %v170_v60   ;;  %403 = vset.pattern.permute.xlu1 %v529_v10 }
 0x296   :  { %307 = vperm.xlu1 %403, %v304_v9  }
 0x29d   :  { %404 = vset.pattern.permute.xlu0 %v529_v10 }
 0x2de   :  { %v242_v2 = vpop.permute.xlu2 %241 }
 0x2df   :  { %v244_v4 = vmul.f32 %v357_v46, %v242_v2 }
 0x2e6   :  { %v235_v20 = vpop.permute.xlu2 %234 }
 0x2e7   :  { %v238_v27 = vadd.f32 %v235_v20, %v210_v19 }
 0x2ee   :  { %v246_v63 = vpop.permute.xlu1 %245  ;;  %v312_v24 = vpop.permute.xlu2 %311 }
 0x2ef   :  { %v249_v3 = vmul.f32 %v570_v29, %v246_v63 }
 0x2f6   :  { %v259_v11 = vpop.permute.xlu1 %258 }
 0x2f7   :  { %v248_v0 = vpop.permute.xlu0 %247 }
 0x2f8   :  { %v250_v1 = vmul.f32 %v570_v29, %v248_v0 }
 0x2fa   :  { %280 = vmatpush.msra.mxu2 %v250_v1 }
 0x2fc   :  { %281 = vmatpush.msra.mxu2 %v249_v3 }
 0x2fe   :  { %282 = vmatpush.msra.mxu2 %v244_v4 }
 0x2ff   :  { %v240_v5 = vpop.permute.xlu0 %239  ;;  %v231_v15 = vpop.permute.xlu1 %230 }
 0x300   :  { %v243_v6 = vmul.f32 %v357_v46, %v240_v5  ;;  %v237_v18 = vadd.f32 %v231_v15, %v207_v16 }
 0x302   :  { %283 = vmatpush.msra.mxu2 %v243_v6 }
 0x303   :  { %364 = vmatmul.msk.f32.vlgmr.msra.gmra.mxu2 %vm261_vm4, %v251_v7 }
 0x307   :  { %v255_v12 = vpop.permute.xlu0 %254 }
 0x308   :  { %v308_v23 = vpop.permute.xlu1 %307 }
 0x30b   :  { %365 = vmatmul.msk.f32.gmra.mxu2 %vm261_vm4, %v252_v8 }
 0x386   :  { %v285_v13 = vpop.f32.mrf.mxu2 }
 0x387   :  { %v286_v14 = vadd.f32 %v285_v13, %v255_v12 }
 0x389   :  { %v291_v17 = vmax.f32 %v286_v14, 0.0 }
 0x38b   :  { %v293_v22 = vadd.f32 %v291_v17, %v237_v18 }
 0x38d   :  { %v295_v29 = vmax.f32 %v293_v22, 0.0 }
 0x38e   :  { %v288_v21 = vpop.f32.mrf.mxu2 }
 0x38f   :  { %v289_v26 = vadd.f32 %v288_v21, %v259_v11  ;;  %v297_v35 = vmul.f32 %v358_v31, %v295_v29 }
 0x391   :  { %v292_v28 = vmax.f32 %v289_v26, 0.0  ;;  %v301_v38 = vadd.f32 %v299_v36, %v297_v35 }
 0x393   :  { %v294_v30 = vadd.f32 %v292_v28, %v238_v27 }
 0x395   :  { %v296_v32 = vmax.f32 %v294_v30, 0.0 }
 0x397   :  { %v298_v34 = vmul.f32 %v358_v31, %v296_v32 }
 0x399   :  { %v302_v37 = vadd.f32 %v300_v33, %v298_v34 }
 0x39b   :  { %330 = vmatpush.msrb.mxu3 %v302_v37 }
 0x39d   :  { %331 = vmatpush.msrb.mxu3 %v301_v38 }
 0x39e   :  { %366 = vmatmul.msk.f32.vlgmr.msrb.gmra.mxu3 %vm313_vm8, %v312_v24 }
 0x421   :  { %v333_v25 = vpop.f32.mrf.mxu3 }
 0x422   :  { %v334_v39 = vadd.f32 %v333_v25, %v308_v23 }
 0x424   :  { %336 = vst [vmem:[#allocation8] sm:$0xf] %v334_v39 }
 0x425   :  { %347 = dma.vmem_to_hbm [thread:$0]  %s343_s4, 64, %s345_s7, [#allocation4]  }
 0x426   :  { %508 = dma.done.wait [#allocation4], 64  }
 0x427   :  { %509 = vsyncadd [#allocation4], 4294967232 }
 0x428   :  { %352 = vsyncpa [#allocation3], 1 }
 0x429   :  { %353 = vsyncpa [#allocation6], 1 }
 0x42a   :  { %354 = vsyncpa [#allocation4], 1 }

</bundles_post_ra>
